<compile_context>
chip_gen: v7x
topology: tpu7x:2x2x1
jax: 0.10.0
libtpu: 0.0.40
codegen_flags: <defaults>
</compile_context>

<pallas_src>
import jax
import jax.numpy as jnp
from jax.experimental import pallas as pl
from jax.experimental.pallas import tpu as pltpu


def _round_up(n: int, m: int) -> int:
    return (n + m - 1) // m * m


def _wap_kernel(x_ref, w_ref, b_ref, m_ref, o_ref, acc_ref, den_ref):
    """One (batch row, S-chunk) step of weighted average pooling."""
    s_idx = pl.program_id(1)

    @pl.when(s_idx == 0)
    def _init():
        acc_ref[...] = jnp.zeros_like(acc_ref)
        den_ref[...] = jnp.zeros_like(den_ref)

    x = x_ref[0]                       # (s_t, H_pad), x.dtype
    m = m_ref[0].astype(jnp.float32)   # (s_t, 1), S on sublanes

    # Gate logits for this S chunk: (s_t, H) @ (H, 1) -> (s_t, 1)   [MXU]
    logits = jnp.dot(x, w_ref[...], preferred_element_type=jnp.float32)
    logits = logits + b_ref[...]            # (1, 1) bias broadcast
    logits = logits + jnp.log(m)            # log(0) = -inf  =>  gate 0 at padding
    gates = 1.0 / (1.0 + jnp.exp(-logits))  # sigmoid, (s_t, 1) f32   [EUP]

    # Weighted partial sum over this chunk: sum_s gates * x -> (1, H_pad)  [VPU+XLU]
    acc_ref[...] += jnp.sum(x.astype(jnp.float32) * gates, axis=0, keepdims=True)
    den_ref[...] += jnp.sum(m, axis=0, keepdims=True)

    @pl.when(s_idx == pl.num_programs(1) - 1)
    def _finalize():
        o_ref[0] = (acc_ref[...] / den_ref[...]).astype(o_ref.dtype)


def weighted_average_pooling_1d(x, w, bias=None, padding_mask=None, *,
                                s_tile_target=256,
                                vmem_tile_budget_bytes=4 * 1024 * 1024):
    """Weighted average pooling over axis 1 of x (B, S, H) -> (B, H)."""
    B, S, H = x.shape
    dtype = x.dtype
    itemsize = jnp.dtype(dtype).itemsize

    H_pad = _round_up(H, 128)                     # lane-dense output / x blocks

    # Pick an S tile: big enough to amortize per-step overhead, small enough
    # that the double-buffered x block stays well inside scoped VMEM.
    row_bytes = H_pad * itemsize
    s_cap = max(8, (vmem_tile_budget_bytes // row_bytes) // 8 * 8)
    s_tile = max(8, min(s_tile_target, s_cap))
    num_s_tiles = pl.cdiv(S, s_tile)
    s_tile = _round_up(pl.cdiv(S, num_s_tiles), 8)
    S_pad = s_tile * num_s_tiles

    # Pad x; padded rows get mask 0 below so they contribute nothing.
    x_p = x
    if (S_pad, H_pad) != (S, H):
        x_p = jnp.pad(x, ((0, 0), (0, S_pad - S), (0, H_pad - H)))

    # Mask: all-ones when absent (log(1)=0, sum(mask)=S == torch.mean).
    if padding_mask is None:
        mask = jnp.ones((B, S), dtype)
    else:
        mask = padding_mask.astype(dtype)
    if S_pad != S:
        mask = jnp.pad(mask, ((0, 0), (0, S_pad - S)))
    mask3 = mask.reshape(B, S_pad, 1)             # S on sublanes in-kernel

    w_col = jnp.asarray(w, dtype).reshape(H, 1)
    if H_pad != H:
        w_col = jnp.pad(w_col, ((0, H_pad - H), (0, 0)))
    b_arr = (jnp.zeros((1, 1), jnp.float32) if bias is None
             else jnp.asarray(bias, jnp.float32).reshape(1, 1))

    grid = (B, S_pad // s_tile)

    out = pl.pallas_call(
        _wap_kernel,
        out_shape=jax.ShapeDtypeStruct((B, 1, H_pad), dtype),
        grid_spec=pltpu.PrefetchScalarGridSpec(
            num_scalar_prefetch=0,
            grid=grid,
            in_specs=[
                pl.BlockSpec((1, s_tile, H_pad), lambda bi, si: (bi, si, 0)),  # x
                pl.BlockSpec((H_pad, 1), lambda bi, si: (0, 0)),               # w_proj weight
                pl.BlockSpec((1, 1), lambda bi, si: (0, 0)),                   # bias (0 if none)
                pl.BlockSpec((1, s_tile, 1), lambda bi, si: (bi, si, 0)),      # mask
            ],
            out_specs=pl.BlockSpec((1, 1, H_pad), lambda bi, si: (bi, 0, 0)),
            scratch_shapes=[
                pltpu.VMEM((1, H_pad), jnp.float32),   # weighted-sum accumulator
                pltpu.VMEM((1, 1), jnp.float32),       # mask-sum accumulator
            ],
        ),
        compiler_params=pltpu.CompilerParams(
            dimension_semantics=("parallel", "arbitrary")),
        cost_estimate=pl.CostEstimate(
            flops=4 * B * S_pad * H_pad,
            transcendentals=2 * B * S_pad,
            bytes_accessed=(x_p.size + mask3.size + w_col.size) * itemsize
                           + B * H_pad * itemsize),
    )(x_p, w_col, b_arr, mask3)

    return out.reshape(B, H_pad)[:, :H]


class WeightedAveragePooling1D:
    """JAX/Pallas equivalent of the PyTorch WeightedAveragePooling1D module.

    Holds the Linear(embed_dim, 1) projection parameters explicitly:
    `w` has shape (embed_dim,), `b` is an optional scalar (bias=False default).
    """

    def __init__(self, w, b=None):
        self.w = jnp.asarray(w)
        self.b = None if b is None else jnp.asarray(b)

    def __call__(self, x, padding_mask=None):
        return weighted_average_pooling_1d(x, self.w, self.b, padding_mask)


if __name__ == "__main__":
    key = jax.random.PRNGKey(0)
    kx, kw, kb, km = jax.random.split(key, 4)

    B, S, H = 2, 8, 32   # batch, sequence, embed_dim

    # Round x / w to bf16-representable values so the in-kernel MXU matmul
    # (default TPU precision: bf16 operands, f32 accumulation) matches the
    # pure-JAX reference tightly.
    x = jax.random.normal(kx, (B, S, H), jnp.float32)
    x = x.astype(jnp.bfloat16).astype(jnp.float32)
    w = (jax.random.normal(kw, (H,), jnp.float32) * 0.25)
    w = w.astype(jnp.bfloat16).astype(jnp.float32)
    b = jax.random.normal(kb, (), jnp.float32) * 0.1

    # Float padding mask: 1.0 valid, 0.0 padding; at least one valid per row.
    mask = (jax.random.uniform(km, (B, S)) > 0.3).astype(jnp.float32)
    mask = mask.at[:, 0].set(1.0)

    def ref_forward(x, w, b, padding_mask=None):
        logits = jnp.einsum("bsh,h->bs", x, w)
        if b is not None:
            logits = logits + b
        if padding_mask is None:
            gates = jax.nn.sigmoid(logits)
            return jnp.mean(x * gates[..., None], axis=1)
        pm = padding_mask.astype(x.dtype)
        gates = jax.nn.sigmoid(logits + jnp.log(pm))
        return jnp.sum(x * gates[..., None], axis=1) / jnp.sum(pm, axis=1, keepdims=True)

    # Default module: bias=False (matches nn.Linear(embed_dim, 1, bias=False)).
    pooler = WeightedAveragePooling1D(w)

    out_nomask = jax.block_until_ready(pooler(x))
    ref_nomask = ref_forward(x, w, None)
    assert out_nomask.shape == (B, H)
    assert jnp.allclose(out_nomask, ref_nomask, atol=1e-4, rtol=1e-4), "no-mask mismatch"

    out_masked = jax.block_until_ready(pooler(x, mask))
    ref_masked = ref_forward(x, w, None, mask)
    assert out_masked.shape == (B, H)
    assert jnp.allclose(out_masked, ref_masked, atol=1e-4, rtol=1e-4), "masked mismatch"

    # Bias path (bias=True flavour of the module).
    pooler_b = WeightedAveragePooling1D(w, b)
    out_bias = jax.block_until_ready(pooler_b(x, mask))
    ref_bias = ref_forward(x, w, b, mask)
    assert jnp.allclose(out_bias, ref_bias, atol=1e-4, rtol=1e-4), "bias mismatch"

    print("KERNEL_OK")
</pallas_src>

<mosaic_0001>
module attributes {stable_mosaic.version = 11 : i64} {
  func.func @_wap_kernel(%arg0: i32, %arg1: i32, %arg2: memref<1x8x128xf32, #tpu.memory_space<vmem>>, %arg3: memref<128x1xf32, #tpu.memory_space<vmem>>, %arg4: memref<1x1xf32, #tpu.memory_space<vmem>>, %arg5: memref<1x8x1xf32, #tpu.memory_space<vmem>>, %arg6: memref<1x1x128xf32, #tpu.memory_space<vmem>>, %arg7: memref<1x128xf32, #tpu.memory_space<vmem>>, %arg8: memref<1x1xf32, #tpu.memory_space<vmem>>) attributes {dimension_semantics = [#tpu.dimension_semantics<parallel>, #tpu.dimension_semantics<arbitrary>], iteration_bounds = array<i64: 2, 1>, scalar_prefetch = 0 : i64, scratch_operands = 2 : i64, tpu.core_type = #tpu.core_type<tc>, window_params = [{transform_indices = @transform_0, window_bounds = array<i64: 1, 8, 128>}, {pipeline_mode = #tpu.pipeline_mode<synchronous>, transform_indices = @transform_1, window_bounds = array<i64: 128, 1>}, {pipeline_mode = #tpu.pipeline_mode<synchronous>, transform_indices = @transform_2, window_bounds = array<i64: 1, 1>}, {transform_indices = @transform_3, window_bounds = array<i64: 1, 8, 1>}, {transform_indices = @transform_4, window_bounds = array<i64: 1, 1, 128>}]} {
    %c0_i32 = arith.constant 0 : i32
    %0 = arith.cmpi eq, %arg1, %c0_i32 : i32
    %1 = arith.extui %0 : i1 to i32
    %c0_i32_0 = arith.constant 0 : i32
    %2 = arith.cmpi ne, %1, %c0_i32_0 : i32
    scf.if %2 {
      %cst_25 = arith.constant 0.000000e+00 : f32
      %36 = vector.broadcast %cst_25 : f32 to vector<1x128xf32>
      %c0_26 = arith.constant 0 : index
      %c0_27 = arith.constant 0 : index
      %37 = vector.load %arg7[%c0_26, %c0_27] : memref<1x128xf32, #tpu.memory_space<vmem>>, vector<1x128xf32>
      tpu.vector_store %arg7[%c0_26, %c0_27], %36 {strides = array<i32>} : memref<1x128xf32, #tpu.memory_space<vmem>>, vector<1x128xf32>,
      %cst_28 = arith.constant 0.000000e+00 : f32
      %38 = vector.broadcast %cst_28 : f32 to vector<1x1xf32>
      %c0_29 = arith.constant 0 : index
      %c0_30 = arith.constant 0 : index
      %39 = vector.load %arg8[%c0_29, %c0_30] : memref<1x1xf32, #tpu.memory_space<vmem>>, vector<1x1xf32>
      tpu.vector_store %arg8[%c0_29, %c0_30], %38 {strides = array<i32>} : memref<1x1xf32, #tpu.memory_space<vmem>>, vector<1x1xf32>,
    } else {
    }
    %c0 = arith.constant 0 : index
    %c0_1 = arith.constant 0 : index
    %c0_2 = arith.constant 0 : index
    %3 = vector.load %arg2[%c0, %c0_1, %c0_2] : memref<1x8x128xf32, #tpu.memory_space<vmem>>, vector<1x8x128xf32>
    %4 = vector.shape_cast %3 : vector<1x8x128xf32> to vector<8x128xf32>
    %c0_3 = arith.constant 0 : index
    %c0_4 = arith.constant 0 : index
    %c0_5 = arith.constant 0 : index
    %5 = vector.load %arg5[%c0_3, %c0_4, %c0_5] : memref<1x8x1xf32, #tpu.memory_space<vmem>>, vector<1x8x1xf32>
    %6 = vector.shape_cast %5 : vector<1x8x1xf32> to vector<8x1xf32>
    %c0_6 = arith.constant 0 : index
    %c0_7 = arith.constant 0 : index
    %7 = vector.load %arg3[%c0_6, %c0_7] : memref<128x1xf32, #tpu.memory_space<vmem>>, vector<128x1xf32>
    %cst = arith.constant dense<0.000000e+00> : vector<8x1xf32>
    %8 = tpu.matmul %4, %7, %cst {dimension_numbers = #tpu.dot_dimension_numbers<[1], [0], [0], [1], [0, 0, 1, 1], [], []>} : vector<8x128xf32>, vector<128x1xf32>, vector<8x1xf32> -> vector<8x1xf32>
    %c0_8 = arith.constant 0 : index
    %c0_9 = arith.constant 0 : index
    %9 = vector.load %arg4[%c0_8, %c0_9] : memref<1x1xf32, #tpu.memory_space<vmem>>, vector<1x1xf32>
    %10 = vector.broadcast %9 : vector<1x1xf32> to vector<8x1xf32>
    %11 = arith.addf %8, %10 : vector<8x1xf32>
    %12 = math.log %6 : vector<8x1xf32>
    %13 = arith.addf %11, %12 : vector<8x1xf32>
    %cst_10 = arith.constant 0.000000e+00 : f32
    %14 = vector.broadcast %cst_10 : f32 to vector<8x1xf32>
    %15 = arith.subf %14, %13 : vector<8x1xf32>
    %16 = math.exp %15 : vector<8x1xf32>
    %cst_11 = arith.constant 1.000000e+00 : f32
    %17 = vector.broadcast %cst_11 : f32 to vector<8x1xf32>
    %18 = arith.addf %17, %16 : vector<8x1xf32>
    %cst_12 = arith.constant 1.000000e+00 : f32
    %19 = vector.broadcast %cst_12 : f32 to vector<8x1xf32>
    %20 = arith.divf %19, %18 : vector<8x1xf32>
    %c0_13 = arith.constant 0 : index
    %c0_14 = arith.constant 0 : index
    %21 = vector.load %arg7[%c0_13, %c0_14] : memref<1x128xf32, #tpu.memory_space<vmem>>, vector<1x128xf32>
    %22 = vector.broadcast %20 : vector<8x1xf32> to vector<8x128xf32>
    %23 = arith.mulf %4, %22 : vector<8x128xf32>
    %cst_15 = arith.constant dense<0.000000e+00> : vector<128xf32>
    %24 = vector.multi_reduction <add>, %23, %cst_15 [0] : vector<8x128xf32> to vector<128xf32>
    %25 = vector.shape_cast %24 : vector<128xf32> to vector<1x128xf32>
    %26 = arith.addf %21, %25 : vector<1x128xf32>
    %c0_16 = arith.constant 0 : index
    %c0_17 = arith.constant 0 : index
    %27 = vector.load %arg7[%c0_16, %c0_17] : memref<1x128xf32, #tpu.memory_space<vmem>>, vector<1x128xf32>
    tpu.vector_store %arg7[%c0_16, %c0_17], %26 {strides = array<i32>} : memref<1x128xf32, #tpu.memory_space<vmem>>, vector<1x128xf32>,
    %c0_18 = arith.constant 0 : index
    %c0_19 = arith.constant 0 : index
    %28 = vector.load %arg8[%c0_18, %c0_19] : memref<1x1xf32, #tpu.memory_space<vmem>>, vector<1x1xf32>
    %cst_20 = arith.constant dense<0.000000e+00> : vector<1xf32>
    %29 = vector.multi_reduction <add>, %6, %cst_20 [0] : vector<8x1xf32> to vector<1xf32>
    %30 = vector.shape_cast %29 : vector<1xf32> to vector<1x1xf32>
    %31 = arith.addf %28, %30 : vector<1x1xf32>
    %c0_21 = arith.constant 0 : index
    %c0_22 = arith.constant 0 : index
    %32 = vector.load %arg8[%c0_21, %c0_22] : memref<1x1xf32, #tpu.memory_space<vmem>>, vector<1x1xf32>
    tpu.vector_store %arg8[%c0_21, %c0_22], %31 {strides = array<i32>} : memref<1x1xf32, #tpu.memory_space<vmem>>, vector<1x1xf32>,
    %c0_i32_23 = arith.constant 0 : i32
    %33 = arith.cmpi eq, %arg1, %c0_i32_23 : i32
    %34 = arith.extui %33 : i1 to i32
    %c0_i32_24 = arith.constant 0 : i32
    %35 = arith.cmpi ne, %34, %c0_i32_24 : i32
    scf.if %35 {
      %c0_25 = arith.constant 0 : index
      %c0_26 = arith.constant 0 : index
      %36 = vector.load %arg7[%c0_25, %c0_26] : memref<1x128xf32, #tpu.memory_space<vmem>>, vector<1x128xf32>
      %c0_27 = arith.constant 0 : index
      %c0_28 = arith.constant 0 : index
      %37 = vector.load %arg8[%c0_27, %c0_28] : memref<1x1xf32, #tpu.memory_space<vmem>>, vector<1x1xf32>
      %38 = vector.broadcast %37 : vector<1x1xf32> to vector<1x128xf32>
      %39 = arith.divf %36, %38 : vector<1x128xf32>
      %c0_29 = arith.constant 0 : index
      %c0_30 = arith.constant 0 : index
      %c0_31 = arith.constant 0 : index
      %40 = vector.load %arg6[%c0_29, %c0_30, %c0_31] : memref<1x1x128xf32, #tpu.memory_space<vmem>>, vector<1x1x128xf32>
      %41 = vector.shape_cast %40 : vector<1x1x128xf32> to vector<1x128xf32>
      %42 = vector.shape_cast %39 : vector<1x128xf32> to vector<1x1x128xf32>
      tpu.vector_store %arg6[%c0_29, %c0_30, %c0_31], %42 {strides = array<i32>} : memref<1x1x128xf32, #tpu.memory_space<vmem>>, vector<1x1x128xf32>,
    } else {
    }
    return
  }
  func.func @transform_0(%arg0: i32, %arg1: i32) -> (i32, i32, i32) {
    %c0_i32 = arith.constant 0 : i32
    %c0_i32_0 = arith.constant 0 : i32
    return %arg0, %arg1, %c0_i32 : i32, i32, i32
  }
  func.func @transform_1(%arg0: i32, %arg1: i32) -> (i32, i32) {
    %c0_i32 = arith.constant 0 : i32
    %c0_i32_0 = arith.constant 0 : i32
    %c0_i32_1 = arith.constant 0 : i32
    return %c0_i32, %c0_i32_0 : i32, i32
  }
  func.func @transform_2(%arg0: i32, %arg1: i32) -> (i32, i32) {
    %c0_i32 = arith.constant 0 : i32
    %c0_i32_0 = arith.constant 0 : i32
    %c0_i32_1 = arith.constant 0 : i32
    return %c0_i32, %c0_i32_0 : i32, i32
  }
  func.func @transform_3(%arg0: i32, %arg1: i32) -> (i32, i32, i32) {
    %c0_i32 = arith.constant 0 : i32
    %c0_i32_0 = arith.constant 0 : i32
    return %arg0, %arg1, %c0_i32 : i32, i32, i32
  }
  func.func @transform_4(%arg0: i32, %arg1: i32) -> (i32, i32, i32) {
    %c0_i32 = arith.constant 0 : i32
    %c0_i32_0 = arith.constant 0 : i32
    %c0_i32_1 = arith.constant 0 : i32
    return %arg0, %c0_i32, %c0_i32_0 : i32, i32, i32
  }
}

</mosaic_0001>

<bundles_post_ra>
// kernel: tpu_custom_call.1
= control target key start
LH: loop header
LB: loop body
LE: loop exit
PB: predicated region body
PF: predicated region fallthrough
CT: control target
= control target key end

     0   :  { %s934_s0 = inlined_call_operand.vmem [shape: f32[2,8,128], index: 0, kind: input, shape index: {}]   ;;  %s935_s1 = inlined_call_operand.vmem [shape: f32[128,1], index: 1, kind: input, shape index: {}]   ;;  %s936_s2 = inlined_call_operand.<no memory space> [shape: f32[1,1], index: 2, kind: input, shape index: {}]   ;;  %s937_s3 = inlined_call_operand.vmem [shape: f32[2,8,1], index: 3, kind: input, shape index: {}]   ;;  %s938_s4 = inlined_call_operand.hbm [shape: f32[2,1,128], index: 4, kind: output, shape index: {}]  }
   0x1   :  { %v9_v0 = vstv %s936_s2 }
   0x2   :  { %10 = vst [vmem:[#allocation4] sm:$0x1] %v9_v0 }
   0x3   :  { %11 = vsyncpa [#allocation6], 0 }
   0x4   :  { %13 = vsyncpa [#allocation6 + $0x1], 0  ;;  %s762_s17 = smov 0   ;;  %s764_s18 = smov 0  }
   0x5   :  { %s766_s19 = smov 0   ;;  %s768_s20 = smov 0  }
   0x6   :  { %s770_s21 = smov 0   ;;  %s772_s22 = smov 0  }
   0x7 LB: > { %s494_s2 = sadd.s32 4294967295, %s727_s22   ;;  %s495_s23 = sadd.s32 4294967294, %s727_s22   ;;  %s727_s22 = sphi %s772_s22, %s19_s22   ;;  %s723_s21 = sphi %s770_s21, %s945_s21   ;;  %s719_s20 = sphi %s768_s20, %s944_s20   ;;  %s715_s19 = sphi %s766_s19, %s943_s19   ;;  %s711_s18 = sphi %s764_s18, %s942_s18   ;;  %s707_s17 = sphi %s762_s17, %s941_s17  }
   0x8   : > { %s31_s24 = sadd.s32 1, %s723_s21  ;;  %s136_s25 = sadd.s32 1, %s715_s19 }
   0x9   : > { %p33_p0 = scmp.ge.s32.totalorder %s31_s24, 2  ;;  %p146_p1 = scmp.ne.s32.totalorder %s715_s19, %s711_s18 }
   0xa   : > { %p147_p2 = scmp.eq.s32.totalorder %s494_s2, 1  ;;  %p152_p3 = scmp.ne.s32.totalorder %s711_s18, %s707_s17 }
   0xb   : > { %s947_s24 = smov (%p33_p0, %s31_s24), 0  ;;  %p153_p5 = scmp.eq.s32.totalorder %s495_s23, 1 }
   0xc   : > { %p802_p4 = por %p147_p2, %p146_p1  ;;  %s133_s27 = ssub.s32 %s723_s21, %s947_s24 }
   0xd   : > { %p498_p6 = scmp.ge.s32.totalorder %s727_s22, 1  ;;  %p134_p7 = scmp.eq.s32.totalorder %s133_s27, 0 }
   0xe   : > { %p809_p8 = por %p153_p5, %p152_p3  ;;  %p197_p9 = scmp.lt.s32.totalorder %s727_s22, 3 }
   0xf   : > { %s815_s29 = scalar_select %p134_p7, %s715_s19, %s136_s25  }
  0x10   : > { %p198_p10 = pnand %p498_p6, %p197_p9 }
  0x11   : > { %v254_v1 = vld [vmem:[%s935_s1] sm:$0xff] (!%p198_p10)  ;;  %v255_v2 = vld [vmem:[%s935_s1 + $0x8] sm:$0xff] (!%p198_p10)  ;;  %v256_v3 = vld [vmem:[%s935_s1 + $0x10] sm:$0xff] (!%p198_p10)  ;;  %vm250_vm0 = vcmask (!%p198_p10), 0   ;;  %v729_v4 = vmov (!%p198_p10), 0.0|0.0   ;;  %v730_v7 = vmov (!%p198_p10), 0.0   ;;  %v393_v52 = vlaneseq (!%p198_p10) }
  0x12   : > { %201 = sbr.rel (%p198_p10) target bundleno = 463 (0x1cf), region = 36  ;;  %557 = vmatprep.subr.bf16.mxu0 (!%p198_p10), %v729_v4  ;;  %v558_v5 = vpack.c.bf16 (!%p198_p10), %v255_v2, %v254_v1  ;;  %v257_v6 = vld [vmem:[%s935_s1 + $0x18] sm:$0xff] (!%p198_p10)  ;;  %249 = vst [vmem:[#allocation2] sm:$0x1] (!%p198_p10), %v730_v7  ;;  %251 = vst.msk [vmem:[#allocation3] sm:$0x1] (!%p198_p10), %vm250_vm0, %v730_v7 }
  0x13   : > { %p231_p11 = scmp.lt.s32.totalorder (!%p198_p10), %s719_s20, 1  ;;  %vm731_vm1 = vmmov (!%p198_p10), 0   ;;  %v561_v8 = vpack.c.bf16 (!%p198_p10), %v257_v6, %v256_v3  ;;  %v258_v9 = vld [vmem:[%s935_s1 + $0x20] sm:$0xff] (!%p198_p10)  ;;  %v259_v10 = vld [vmem:[%s935_s1 + $0x28] sm:$0xff] (!%p198_p10)  ;;  %vm372_vm2 = vcmask (!%p198_p10), 7168   ;;  %v260_v13 = vld [vmem:[%s935_s1 + $0x30] sm:$0xff] (!%p198_p10) }
  0x14   : > { %554 = vmatprep.mubr.msk.f32.mxu0 (!%p198_p10), %vm731_vm1, %v730_v7  ;;  %559 = vmatpush3.bf16.msra.mxu0 (!%p198_p10), %v558_v5  ;;  %v564_v11 = vpack.c.bf16 (!%p198_p10), %v259_v10, %v258_v9  ;;  %v261_v14 = vld [vmem:[%s935_s1 + $0x38] sm:$0xff] (!%p198_p10)  ;;  %v262_v19 = vld [vmem:[%s935_s1 + $0x40] sm:$0xff] (!%p198_p10)  ;;  %v263_v20 = vld [vmem:[%s935_s1 + $0x48] sm:$0xff] (!%p198_p10)  ;;  %v732_v38 = vmov (!%p198_p10), 0   ;;  %v394_v55 = vshrl.u32 (!%p198_p10), %v393_v52, 7 }
  0x15   : > { %560 = vmatprep.subr.bf16.mxu0 (!%p198_p10), %v729_v4  ;;  %v567_v17 = vpack.c.bf16 (!%p198_p10), %v261_v14, %v260_v13  ;;  %v570_v22 = vpack.c.bf16 (!%p198_p10), %v263_v20, %v262_v19  ;;  %v264_v24 = vld [vmem:[%s935_s1 + $0x50] sm:$0xff] (!%p198_p10)  ;;  %v265_v25 = vld [vmem:[%s935_s1 + $0x58] sm:$0xff] (!%p198_p10)  ;;  %v266_v30 = vld [vmem:[%s935_s1 + $0x60] sm:$0xff] (!%p198_p10)  ;;  %640 = vset.pattern.permute.xlu0 (!%p198_p10), %v732_v38 }
  0x16   : > { %v573_v28 = vpack.c.bf16 (!%p198_p10), %v265_v25, %v264_v24  ;;  %v267_v31 = vld [vmem:[%s935_s1 + $0x68] sm:$0xff] (!%p198_p10)  ;;  %v268_v34 = vld [vmem:[%s935_s1 + $0x70] sm:$0xff] (!%p198_p10)  ;;  %v269_v35 = vld [vmem:[%s935_s1 + $0x78] sm:$0xff] (!%p198_p10)  ;;  %v395_v58 = vsub.s32 (!%p198_p10), 0, %v394_v55 }
  0x17   : > { %v576_v33 = vpack.c.bf16 (!%p198_p10), %v267_v31, %v266_v30  ;;  %v579_v36 = vpack.c.bf16 (!%p198_p10), %v269_v35, %v268_v34  ;;  %v501_v40 = vld [vmem:[#allocation4] ss:$0 sm:$0xff] (!%p198_p10) }
  0x18   : > { %562 = vmatpush3.bf16.msra.mxu0 (!%p198_p10), %v561_v8 }
  0x19   : > { %s832_s12 = scalar_select %p231_p11, %s719_s20, 1  ;;  %563 = vmatprep.subr.bf16.mxu0 %v729_v4  ;;  %v371_v27 = vld [vmem:[#allocation3] sm:$0x1]  ;;  %v356_v0 = vld [vmem:[#allocation2] sm:$0x1] }
  0x1b   : > { %s499_s2 = sshll.u32 %s832_s12, 3  ;;  %s229_s12 = sand.u32 1, %s711_s18  }
  0x1c   : > { %s244_s27 = scalar_lea.vmem %s937_s3, %s499_s2  ;;  %565 = vmatpush3.bf16.msra.mxu0 %v564_v11  ;;  %s237_s11 = scalar_lea.vmem %s934_s0, %s499_s2 }
  0x1d   : > { %v253_v12 = vld [vmem:[%s244_s27] sm:$0xff]  ;;  %566 = vmatprep.subr.bf16.mxu0 %v729_v4  ;;  %s502_s2 = sshll.u32 %s719_s20, 4  ;;  %s230_s13 = scalar_lea.vmem [#allocation5], %s229_s12 }
  0x1e   : > { %v373_v15 = vsel %vm372_vm2, %v253_v12, 0.0  ;;  %v252_v37 = vld [vmem:[%s237_s11] sm:$0xff]  ;;  %641 = vlog2.f32 %v253_v12  ;;  %s413_s14 = sshll.u32 %s230_s13, 4  ;;  %s887_s23 = scalar_lea.hbm %s938_s4, %s502_s2  ;;  %s889_s14 = int_to_ptr.vmem [resolvable:$true] %s413_s14 }
  0x1f   : > { %v374_v16 = vrot.slane %v373_v15, 4  ;;  %s401_s25 = scalar_lea.sflag [#allocation6], %s229_s12  ;;  %s649_s27 = scalar_lea.vmem %s889_s14, 16 }
  0x20   : > { %568 = vmatpush3.bf16.msra.mxu0 %v567_v17  ;;  %p650_p12 = scmp.ne.s32.totalorder %s889_s14, %s649_s27  ;;  %s733_s20 = smov [#allocation5]  }
  0x21   : > { %v375_v18 = vadd.f32 %v374_v16, %v373_v15  ;;  %569 = vmatprep.subr.bf16.mxu0 %v729_v4  ;;  %s653_s30 = sshll.u32 %s733_s20, 4  ;;  %s654_s30 = int_to_ptr.vmem [resolvable:$false] %s653_s30 }
  0x22   : > { %p651_p13 = pnand %p650_p12, %p802_p4  ;;  %s655_s5 = scalar_lea.vmem %s654_s30, 32 }
  0x23   : > { %v376_v21 = vrot.slane %v375_v18, 2  ;;  %p656_p1 = scmp.lt.s32.totalorder %s889_s14, %s654_s30  ;;  %p657_p2 = scmp.lt.s32.totalorder %s655_s5, %s649_s27 }
  0x24   : > { %571 = vmatpush3.bf16.msra.mxu0 %v570_v22  ;;  %p652_p0 = pneg %p651_p13 }
  0x25   : > { %v377_v23 = vadd.f32 %v376_v21, %v375_v18  ;;  %572 = vmatprep.subr.bf16.mxu0 %v729_v4  ;;  %p658_p3 = por %p657_p2, %p656_p1 }
  0x27   : > { %v378_v26 = vrot.slane %v377_v23, 1  ;;  %p659_p5 = pnand %p658_p3, %p652_p0 }
  0x28   : > { %574 = vmatpush3.bf16.msra.mxu0 %v573_v28  ;;  %v642_v39 = vpop.eup %641 }
  0x29   : > { %v379_v29 = vadd.f32 %v378_v26, %v377_v23  ;;  %575 = vmatprep.subr.bf16.mxu0 %v729_v4  ;;  %v348_v41 = vmul.f32 0.6931472, %v642_v39 }
  0x2b   : > { %v380_v32 = vadd.f32 %v379_v29, %v371_v27 }
  0x2c   : > { %577 = vmatpush3.bf16.msra.mxu0 %v576_v33 }
  0x2d   : > { %382 = vst.msk [vmem:[#allocation3] sm:$0x1] %vm250_vm0, %v380_v32  ;;  %578 = vmatprep.subr.bf16.mxu0 %v729_v4 }
  0x30   : > { %580 = vmatpush3.bf16.msra.mxu0 %v579_v36 }
  0x33   : > { %555 = vmatmul.mubr.f32.vlgmr.msra.gmra.mrb[0].mxu0 %v252_v37 }
  0x34   : > { %v387_v51 = vld [vmem:[#allocation3] sm:$0x1] }
 0x106   : > { %v343_v42 = vpop.f32.mrb[0].mxu0 }
 0x107   : > { %v344_v43 = vadd.f32 %v501_v40, %v343_v42  ;;  %v556_v44 = vpop.f32.mrb[1].mxu0 }
 0x109   : > { %v349_v45 = vadd.f32 %v348_v41, %v344_v43 }
 0x10b   : > { %v350_v46 = vsub.f32 0.0, %v349_v45 }
 0x10d   : > { %v351_v47 = vmul.f32 1.442695, %v350_v46 }
 0x10f   : > { %643 = vpow2.f32 %v351_v47 }
 0x119   : > { %v644_v48 = vpop.eup %643 }
 0x11a   : > { %v353_v49 = vadd.f32 1.0, %v644_v48 }
 0x11c   : > { %645 = vrcp.f32 %v353_v49 }
 0x126   : > { %v646_v50 = vpop.eup %645 }
 0x127   : > { %359 = vperm.xlu0 %640, %v646_v50  }
 0x12b   : > { %390 = vperm.xlu0 %640, %v387_v51  }
 0x1a6   : > { %v360_v53 = vpop.permute.xlu0 %359 }
 0x1a7   : > { %v362_v54 = vmul.f32 %v360_v53, %v252_v37 }
 0x1a9   : > { %v363_v56 = vrot.slane %v362_v54, 4 }
 0x1aa   : > { %v391_v60 = vpop.permute.xlu0 %390 }
 0x1ab   : > { %v364_v57 = vadd.f32 %v363_v56, %v362_v54  ;;  %v396_v62 = vrot.slane %v391_v60, %v395_v58 }
 0x1ad   : > { %v365_v59 = vrot.slane %v364_v57, 2  ;;  %647 = vrcp.f32 %v396_v62 }
 0x1af   : > { %v366_v61 = vadd.f32 %v365_v59, %v364_v57 }
 0x1b1   : > { %v367_v63 = vrot.slane %v366_v61, 1 }
 0x1b3   : > { %v368_v1 = vadd.f32 %v367_v63, %v366_v61 }
 0x1b5   : > { %v369_v2 = vadd.f32 %v368_v1, %v356_v0 }
 0x1b7   : > { %370 = vst [vmem:[#allocation2] sm:$0x1] %v369_v2  ;;  %v648_v3 = vpop.eup %647 }
 0x1be   : > { %v386_v4 = vld [vmem:[#allocation2] sm:$0x1] }
 0x1bf   : > { %v398_v5 = vmul.f32 %v648_v3, %v386_v4 }
 0x1c1   : > { %399 = vst [vmem:[%s230_s13] sm:$0x1] %v398_v5 }
 0x1c2   : > { %662 = shalt.err (!%p659_p5)
}
 0x1c3   : > { %s663_s6 = scalar_lea.hbm %s887_s23, 16  ;;  %s667_s9 = scalar_lea.hbm %s938_s4, 32 }
 0x1c4   : > { %p664_p6 = scmp.ne.s32.totalorder %s887_s23, %s663_s6  ;;  %p668_p10 = scmp.lt.u32.totalorder %s887_s23, %s938_s4 }
 0x1c5   : > { %p669_p11 = scmp.lt.u32.totalorder %s667_s9, %s663_s6  ;;  %p671_p13 = scmp.lt.u32.totalorder %s663_s6, %s887_s23 }
 0x1c6   : > { %p665_p7 = pnand %p664_p6, %p802_p4 }
 0x1c7   : > { %p670_p12 = por %p669_p11, %p668_p10 }
 0x1c8   : > { %p666_p9 = pneg %p665_p7 }
 0x1c9   : > { %p672_p0 = por %p671_p13, %p670_p12 }
 0x1cb   : > { %p673_p1 = pnand %p672_p0, %p666_p9 }
 0x1cd   : > { %676 = shalt.err (!%p673_p1)
}
 0x1ce   : > { %581 = dma.vmem_to_hbm [thread:$0]  (%p802_p4), %s889_s14, 16, %s887_s23, %s401_s25  }
 0x1cf PF: > { %p587_p2 = scmp.ge.s32.totalorder %s727_s22, 2  ;;  %s425_s12 = sand.u32 1, %s707_s17  }
 0x1d0   : > { %s426_s2 = scalar_lea.sflag [#allocation6], %s425_s12 }
 0x1d1   : > { %p584_p3 = pnand %p587_p2, %p809_p8 }
 0x1d3   : > { %702 = dma.done.wait (!%p584_p3), %s426_s2, 16  }
 0x1d4   : > { %704 = vsyncadd (!%p584_p3), %s426_s2, 4294967280  ;;  %s19_s22 = sadd.s32 1, %s727_s22   ;;  %s941_s17 = smov %s711_s18 }
 0x1d5   : > { %p16_p5 = scmp.ge.s32.totalorder %s19_s22, 4   ;;  %s942_s18 = smov %s715_s19 }
 0x1d6   : > { %s943_s19 = smov %s815_s29  ;;  %s944_s20 = smov %s723_s21 }
 0x1d7   : > { %s945_s21 = smov %s947_s24  ;;  %18 = sbr.rel (!%p16_p5) target bundleno = 7 (0x7), region = 82 }
 0x1de   :  { %430 = vsyncpa [#allocation6], 1 }
 0x1df   :  { %432 = vsyncpa [#allocation6 + $0x1], 1 }

</bundles_post_ra>
